<compile_context>
chip_gen: v7x
topology: tpu7x:2x2x1
jax: 0.10.0
libtpu: 0.0.40
codegen_flags: <defaults>
</compile_context>

<pallas_src>
import jax
import jax.numpy as jnp
from jax.experimental import pallas as pl
from jax.experimental.pallas import tpu as pltpu

# Hyperparameters from CNNModel.__init__ defaults
VOCAB_SIZE = 300
EMBED_SIZE = 64
CONTEXT_WINDOW = 6
KERNEL_SIZE = 5
CONV_OUT = 6
HIDDEN_DIM = 128
SEQ_LEN = CONTEXT_WINDOW * 2 + 1            # 13
CONV_LEN = SEQ_LEN - KERNEL_SIZE + 1        # 9
FLAT_DIM = CONV_LEN * CONV_OUT              # 54
IN_DIM = SEQ_LEN * EMBED_SIZE               # 832  (fused conv+fc1 contraction)

MAX_BATCH_TILE = 512                        # sized against v7x 64 MiB VMEM


def _round_up(x, m):
    return (x + m - 1) // m * m


def cnn_kernel(x_ref, w1_ref, b1_ref, w2_ref, b2_ref, o_ref):
    """One batch tile of the forward pass (post-embedding).

    x_ref:  (TB, L*E) f32   embedded tokens, flattened row-major (l, e)
    w1_ref: (L*E, H)  f32   fused conv1d+flatten+fc1 weight
    b1_ref: (1, H)    f32   fused bias
    w2_ref: (H, 1)    f32   fc2 weight (transposed)
    b2_ref: (1, 1)    f32
    o_ref:  (TB, 1)   f32
    """
    # Fused (conv1d -> flatten -> fc1): one MXU matmul, 832-deep contraction.
    h = jnp.dot(x_ref[...], w1_ref[...], preferred_element_type=jnp.float32)
    h = jnp.maximum(h + b1_ref[...], 0.0)                       # bias + ReLU (TB, H)

    # dropout(p=0.2) is identity in eval/inference mode.

    # fc2: one (TB, H) @ (H, 1) matmul.
    z = jnp.dot(h, w2_ref[...], preferred_element_type=jnp.float32) + b2_ref[...]

    # Batched sigmoid + single store for the whole tile.
    o_ref[...] = 1.0 / (1.0 + jnp.exp(-z))


def init_params(key):
    """Deterministic synthetic parameters matching the PyTorch module shapes."""
    ks = jax.random.split(key, 7)
    emb_table = jax.random.normal(ks[0], (VOCAB_SIZE, EMBED_SIZE), jnp.float32)
    bc = 1.0 / (EMBED_SIZE * KERNEL_SIZE) ** 0.5
    conv_w = jax.random.uniform(ks[1], (CONV_OUT, EMBED_SIZE, KERNEL_SIZE),
                                jnp.float32, -bc, bc)
    conv_b = jax.random.uniform(ks[2], (CONV_OUT,), jnp.float32, -bc, bc)
    b1 = 1.0 / FLAT_DIM ** 0.5
    fc1_w = jax.random.uniform(ks[3], (HIDDEN_DIM, FLAT_DIM), jnp.float32, -b1, b1)
    fc1_b = jax.random.uniform(ks[4], (HIDDEN_DIM,), jnp.float32, -b1, b1)
    b2 = 1.0 / HIDDEN_DIM ** 0.5
    fc2_w = jax.random.uniform(ks[5], (1, HIDDEN_DIM), jnp.float32, -b2, b2)
    fc2_b = jax.random.uniform(ks[6], (1,), jnp.float32, -b2, b2)
    return dict(emb=emb_table, conv_w=conv_w, conv_b=conv_b,
                fc1_w=fc1_w, fc1_b=fc1_b, fc2_w=fc2_w, fc2_b=fc2_b)


def _fold_conv_fc1(params):
    """Fold conv1d + channel-major flatten + fc1 into one (L*E, H) linear map.

    fc1_out[b,h] = fc1_b[h] + sum_{c,p} (conv_b[c] + sum_{e,k} emb[b,p+k,e]*conv_w[c,e,k])
                                        * fc1_w[h, c*P + p]
    => W_eff[l,e,h] = sum_{k, c, p=l-k in [0,P)} conv_w[c,e,k] * fc1_w[h,c,p]
       b_eff[h]     = fc1_b[h] + sum_{c,p} conv_b[c] * fc1_w[h,c,p]
    Cost is ~2 MFLOP, negligible next to the batched matmuls it enables.
    """
    fc1_w_3d = params["fc1_w"].reshape(HIDDEN_DIM, CONV_OUT, CONV_LEN)   # (H, C, P)
    a = jnp.einsum("cek,hcp->kpeh", params["conv_w"], fc1_w_3d)          # (K, P, E, H)
    w_eff = jnp.zeros((SEQ_LEN, EMBED_SIZE, HIDDEN_DIM), jnp.float32)
    for k in range(KERNEL_SIZE):                                         # static, K=5
        w_eff = w_eff.at[k:k + CONV_LEN].add(a[k])
    w_eff = w_eff.reshape(IN_DIM, HIDDEN_DIM)                            # (832, 128)
    b_eff = params["fc1_b"] + jnp.einsum("c,hcp->h", params["conv_b"], fc1_w_3d)
    return w_eff, b_eff.reshape(1, HIDDEN_DIM)


@jax.jit
def cnn_forward(tokens, params):
    B = tokens.shape[0]

    # Embedding gather (glue, not the hot path) + flatten to (B, L*E).
    emb = jnp.take(params["emb"], tokens, axis=0)                        # (B, L, E)
    x = emb.reshape(B, IN_DIM)                                           # (B, 832)

    # Fold conv+flatten+fc1 weights once per call (tiny, amortized over batch).
    w_eff, b_eff = _fold_conv_fc1(params)
    fc2_w_r = params["fc2_w"].T                                          # (H, 1)
    fc2_b_r = params["fc2_b"].reshape(1, 1)

    # Batch tiling: TB multiple of 8, capped for VMEM (v7x 64 MiB budget).
    tb = min(MAX_BATCH_TILE, _round_up(B, 8))
    b_pad = _round_up(B, tb)
    if b_pad != B:
        x = jnp.pad(x, ((0, b_pad - B), (0, 0)))
    n_tiles = b_pad // tb

    grid_spec = pltpu.PrefetchScalarGridSpec(
        num_scalar_prefetch=0,
        grid=(n_tiles,),
        in_specs=[
            pl.BlockSpec((tb, IN_DIM), lambda i: (i, 0)),                # activations
            pl.BlockSpec((IN_DIM, HIDDEN_DIM), lambda i: (0, 0)),        # fused W (VMEM-resident)
            pl.BlockSpec((1, HIDDEN_DIM), lambda i: (0, 0)),             # fused b
            pl.BlockSpec((HIDDEN_DIM, 1), lambda i: (0, 0)),             # fc2 W
            pl.BlockSpec((1, 1), lambda i: (0, 0)),                      # fc2 b
        ],
        out_specs=pl.BlockSpec((tb, 1), lambda i: (i, 0)),
    )

    # Scheduler hint: dominated by the fused (B,832)@(832,128) matmul and the
    # activation-slab HBM read.
    flops = 2 * b_pad * (IN_DIM * HIDDEN_DIM + HIDDEN_DIM)
    bytes_accessed = (b_pad * IN_DIM + IN_DIM * HIDDEN_DIM
                      + HIDDEN_DIM + HIDDEN_DIM + 1 + b_pad) * 4
    cost = pl.CostEstimate(flops=flops, transcendentals=b_pad,
                           bytes_accessed=bytes_accessed)

    out = pl.pallas_call(
        cnn_kernel,
        out_shape=jax.ShapeDtypeStruct((b_pad, 1), jnp.float32),
        grid_spec=grid_spec,
        compiler_params=pltpu.CompilerParams(
            dimension_semantics=("parallel",),        # shard batch tiles across v7x TCs
            vmem_limit_bytes=32 * 1024 * 1024,        # explicit, portable to v7x 64 MiB
        ),
        cost_estimate=cost,
    )(x, w_eff, b_eff, fc2_w_r, fc2_b_r)

    return out[:B]


def cnn_reference(tokens, params):
    """Pure-JAX reference replicating the PyTorch forward exactly."""
    emb = jnp.take(params["emb"], tokens, axis=0)                        # (B, L, E)
    x = jnp.transpose(emb, (0, 2, 1))                                    # (B, E, L)
    win = jnp.stack([x[:, :, k:k + CONV_LEN] for k in range(KERNEL_SIZE)],
                    axis=-1)                                             # (B, E, P, K)
    conv = jnp.einsum("bcpk,ock->bop", win, params["conv_w"])
    conv = conv + params["conv_b"][None, :, None]                        # (B, C, P)
    flat = conv.reshape(tokens.shape[0], -1)                             # (B, C*P)
    h = jnp.maximum(flat @ params["fc1_w"].T + params["fc1_b"], 0.0)
    z = h @ params["fc2_w"].T + params["fc2_b"]
    return jax.nn.sigmoid(z)


if __name__ == "__main__":
    key = jax.random.PRNGKey(0)
    pkey, tkey = jax.random.split(key)
    params = init_params(pkey)

    # Small deterministic example input: batch=2, seq_len = 2*context_window+1 = 13
    tokens = jax.random.randint(tkey, (2, SEQ_LEN), 0, VOCAB_SIZE, dtype=jnp.int32)

    out = jax.block_until_ready(cnn_forward(tokens, params))
    ref = cnn_reference(tokens, params)

    assert out.shape == (2, 1), out.shape
    assert jnp.allclose(out, ref, atol=1e-5, rtol=1e-5), (out, ref)
    print("KERNEL_OK")
</pallas_src>

<mosaic_0001>
module attributes {stable_mosaic.version = 11 : i64} {
  func.func @cnn_kernel(%arg0: i32, %arg1: memref<8x832xf32, #tpu.memory_space<vmem>>, %arg2: memref<832x128xf32, #tpu.memory_space<vmem>>, %arg3: memref<1x128xf32, #tpu.memory_space<vmem>>, %arg4: memref<128x1xf32, #tpu.memory_space<vmem>>, %arg5: memref<1x1xf32, #tpu.memory_space<vmem>>, %arg6: memref<8x1xf32, #tpu.memory_space<vmem>>) attributes {dimension_semantics = [#tpu.dimension_semantics<parallel>], iteration_bounds = array<i64: 1>, scalar_prefetch = 0 : i64, scratch_operands = 0 : i64, tpu.core_type = #tpu.core_type<tc>, window_params = [{transform_indices = @transform_0, window_bounds = array<i64: 8, 832>}, {pipeline_mode = #tpu.pipeline_mode<synchronous>, transform_indices = @transform_1, window_bounds = array<i64: 832, 128>}, {pipeline_mode = #tpu.pipeline_mode<synchronous>, transform_indices = @transform_2, window_bounds = array<i64: 1, 128>}, {pipeline_mode = #tpu.pipeline_mode<synchronous>, transform_indices = @transform_3, window_bounds = array<i64: 128, 1>}, {pipeline_mode = #tpu.pipeline_mode<synchronous>, transform_indices = @transform_4, window_bounds = array<i64: 1, 1>}, {transform_indices = @transform_5, window_bounds = array<i64: 8, 1>}]} {
    %c0 = arith.constant 0 : index
    %c0_0 = arith.constant 0 : index
    %0 = vector.load %arg1[%c0, %c0_0] : memref<8x832xf32, #tpu.memory_space<vmem>>, vector<8x832xf32>
    %c0_1 = arith.constant 0 : index
    %c0_2 = arith.constant 0 : index
    %1 = vector.load %arg2[%c0_1, %c0_2] : memref<832x128xf32, #tpu.memory_space<vmem>>, vector<832x128xf32>
    %cst = arith.constant dense<0.000000e+00> : vector<8x128xf32>
    %2 = tpu.matmul %0, %1, %cst {dimension_numbers = #tpu.dot_dimension_numbers<[1], [0], [0], [1], [0, 0, 1, 1], [], []>} : vector<8x832xf32>, vector<832x128xf32>, vector<8x128xf32> -> vector<8x128xf32>
    %c0_3 = arith.constant 0 : index
    %c0_4 = arith.constant 0 : index
    %3 = vector.load %arg3[%c0_3, %c0_4] : memref<1x128xf32, #tpu.memory_space<vmem>>, vector<1x128xf32>
    %4 = vector.broadcast %3 : vector<1x128xf32> to vector<8x128xf32>
    %5 = arith.addf %2, %4 : vector<8x128xf32>
    %cst_5 = arith.constant 0.000000e+00 : f32
    %6 = vector.broadcast %cst_5 : f32 to vector<8x128xf32>
    %7 = arith.maximumf %5, %6 : vector<8x128xf32>
    %c0_6 = arith.constant 0 : index
    %c0_7 = arith.constant 0 : index
    %8 = vector.load %arg4[%c0_6, %c0_7] : memref<128x1xf32, #tpu.memory_space<vmem>>, vector<128x1xf32>
    %cst_8 = arith.constant dense<0.000000e+00> : vector<8x1xf32>
    %9 = tpu.matmul %7, %8, %cst_8 {dimension_numbers = #tpu.dot_dimension_numbers<[1], [0], [0], [1], [0, 0, 1, 1], [], []>} : vector<8x128xf32>, vector<128x1xf32>, vector<8x1xf32> -> vector<8x1xf32>
    %c0_9 = arith.constant 0 : index
    %c0_10 = arith.constant 0 : index
    %10 = vector.load %arg5[%c0_9, %c0_10] : memref<1x1xf32, #tpu.memory_space<vmem>>, vector<1x1xf32>
    %11 = vector.broadcast %10 : vector<1x1xf32> to vector<8x1xf32>
    %12 = arith.addf %9, %11 : vector<8x1xf32>
    %cst_11 = arith.constant 0.000000e+00 : f32
    %13 = vector.broadcast %cst_11 : f32 to vector<8x1xf32>
    %14 = arith.subf %13, %12 : vector<8x1xf32>
    %15 = math.exp %14 : vector<8x1xf32>
    %cst_12 = arith.constant 1.000000e+00 : f32
    %16 = vector.broadcast %cst_12 : f32 to vector<8x1xf32>
    %17 = arith.addf %16, %15 : vector<8x1xf32>
    %cst_13 = arith.constant 1.000000e+00 : f32
    %18 = vector.broadcast %cst_13 : f32 to vector<8x1xf32>
    %19 = arith.divf %18, %17 : vector<8x1xf32>
    %c0_14 = arith.constant 0 : index
    %c0_15 = arith.constant 0 : index
    %20 = vector.load %arg6[%c0_14, %c0_15] : memref<8x1xf32, #tpu.memory_space<vmem>>, vector<8x1xf32>
    tpu.vector_store %arg6[%c0_14, %c0_15], %19 {strides = array<i32>} : memref<8x1xf32, #tpu.memory_space<vmem>>, vector<8x1xf32>,
    return
  }
  func.func @transform_0(%arg0: i32) -> (i32, i32) {
    %c0_i32 = arith.constant 0 : i32
    %c0_i32_0 = arith.constant 0 : i32
    return %arg0, %c0_i32 : i32, i32
  }
  func.func @transform_1(%arg0: i32) -> (i32, i32) {
    %c0_i32 = arith.constant 0 : i32
    %c0_i32_0 = arith.constant 0 : i32
    %c0_i32_1 = arith.constant 0 : i32
    return %c0_i32, %c0_i32_0 : i32, i32
  }
  func.func @transform_2(%arg0: i32) -> (i32, i32) {
    %c0_i32 = arith.constant 0 : i32
    %c0_i32_0 = arith.constant 0 : i32
    %c0_i32_1 = arith.constant 0 : i32
    return %c0_i32, %c0_i32_0 : i32, i32
  }
  func.func @transform_3(%arg0: i32) -> (i32, i32) {
    %c0_i32 = arith.constant 0 : i32
    %c0_i32_0 = arith.constant 0 : i32
    %c0_i32_1 = arith.constant 0 : i32
    return %c0_i32, %c0_i32_0 : i32, i32
  }
  func.func @transform_4(%arg0: i32) -> (i32, i32) {
    %c0_i32 = arith.constant 0 : i32
    %c0_i32_0 = arith.constant 0 : i32
    %c0_i32_1 = arith.constant 0 : i32
    return %c0_i32, %c0_i32_0 : i32, i32
  }
  func.func @transform_5(%arg0: i32) -> (i32, i32) {
    %c0_i32 = arith.constant 0 : i32
    %c0_i32_0 = arith.constant 0 : i32
    return %arg0, %c0_i32 : i32, i32
  }
}

</mosaic_0001>

<bundles_post_ra>
// kernel: cnn_forward.1
= control target key start
LH: loop header
LB: loop body
LE: loop exit
PB: predicated region body
PF: predicated region fallthrough
CT: control target
= control target key end

     0   :  { %vm858_vm0 = vmmov 0   ;;  %vm140_vm1 = vcmask 523264   ;;  %vm524_vm2 = vcmask 7168   ;;  %s1294_s1 = inlined_call_operand.vmem [shape: f32[832,128], index: 1, kind: input, shape index: {}]   ;;  %s1295_s0 = inlined_call_operand.vmem [shape: f32[8,832], index: 0, kind: input, shape index: {}]   ;;  %s1296_s3 = inlined_call_operand.vmem [shape: f32[128,1], index: 3, kind: input, shape index: {}]   ;;  %s1297_s4 = inlined_call_operand.<no memory space> [shape: f32[1,1], index: 4, kind: input, shape index: {}]   ;;  %s1298_s2 = inlined_call_operand.vmem [shape: f32[1,128], index: 2, kind: input, shape index: {}]   ;;  %s1299_s5 = inlined_call_operand.vmem [shape: f32[8,1], index: 5, kind: output, shape index: {}]  }
   0x1   :  { %v45_v0 = vld [vmem:[%s1294_s1 + $0x80] sm:$0xff]  ;;  %v46_v1 = vld [vmem:[%s1294_s1 + $0x88] sm:$0xff]  ;;  %v47_v11 = vld [vmem:[%s1294_s1 + $0x90] sm:$0xff] }
   0x2   :  { %v29_v2 = vld [vmem:[%s1294_s1] sm:$0xff]  ;;  %v718_v3 = vpack.c.bf16 %v46_v1, %v45_v0  ;;  %v30_v4 = vld [vmem:[%s1294_s1 + $0x8] sm:$0xff]  ;;  %v48_v13 = vld [vmem:[%s1294_s1 + $0x98] sm:$0xff] }
   0x3   :  { %v77_v5 = vld [vmem:[%s1294_s1 + $0x180] sm:$0xff]  ;;  %v78_v6 = vld [vmem:[%s1294_s1 + $0x188] sm:$0xff]  ;;  %v720_v7 = vpack.c.bf16 %v30_v4, %v29_v2  ;;  %v31_v14 = vld [vmem:[%s1294_s1 + $0x10] sm:$0xff]  ;;  %v722_v16 = vpack.c.bf16 %v48_v13, %v47_v11 }
   0x4   :  { %v750_v8 = vpack.c.bf16 %v78_v6, %v77_v5  ;;  %v61_v9 = vld [vmem:[%s1294_s1 + $0x100] sm:$0xff]  ;;  %v62_v10 = vld [vmem:[%s1294_s1 + $0x108] sm:$0xff]  ;;  %719 = vmatprep.subr.bf16.mxu0 %v718_v3  ;;  %v32_v15 = vld [vmem:[%s1294_s1 + $0x18] sm:$0xff] }
   0x5   :  { %v752_v12 = vpack.c.bf16 %v62_v10, %v61_v9  ;;  %721 = vmatpush3.bf16.msra.mxu0 %v720_v7  ;;  %v724_v17 = vpack.c.bf16 %v32_v15, %v31_v14  ;;  %v79_v18 = vld [vmem:[%s1294_s1 + $0x190] sm:$0xff]  ;;  %v80_v19 = vld [vmem:[%s1294_s1 + $0x198] sm:$0xff]  ;;  %v49_v23 = vld [vmem:[%s1294_s1 + $0xa0] sm:$0xff] }
   0x6   :  { %751 = vmatprep.subr.bf16.mxu1 %v750_v8  ;;  %v63_v20 = vld [vmem:[%s1294_s1 + $0x110] sm:$0xff]  ;;  %v754_v21 = vpack.c.bf16 %v80_v19, %v79_v18  ;;  %v64_v22 = vld [vmem:[%s1294_s1 + $0x118] sm:$0xff]  ;;  %v50_v24 = vld [vmem:[%s1294_s1 + $0xa8] sm:$0xff]  ;;  %723 = vmatprep.subr.bf16.mxu0 %v722_v16 }
   0x7   :  { %753 = vmatpush3.bf16.msra.mxu1 %v752_v12  ;;  %v756_v25 = vpack.c.bf16 %v64_v22, %v63_v20  ;;  %v726_v26 = vpack.c.bf16 %v50_v24, %v49_v23  ;;  %v33_v27 = vld [vmem:[%s1294_s1 + $0x20] sm:$0xff]  ;;  %v34_v28 = vld [vmem:[%s1294_s1 + $0x28] sm:$0xff]  ;;  %v51_v35 = vld [vmem:[%s1294_s1 + $0xb0] sm:$0xff] }
   0x8   :  { %v81_v29 = vld [vmem:[%s1294_s1 + $0x1a0] sm:$0xff]  ;;  %755 = vmatprep.subr.bf16.mxu1 %v754_v21  ;;  %v82_v30 = vld [vmem:[%s1294_s1 + $0x1a8] sm:$0xff]  ;;  %v728_v33 = vpack.c.bf16 %v34_v28, %v33_v27  ;;  %v52_v36 = vld [vmem:[%s1294_s1 + $0xb8] sm:$0xff] }
   0x9   :  { %v65_v31 = vld [vmem:[%s1294_s1 + $0x120] sm:$0xff]  ;;  %v66_v32 = vld [vmem:[%s1294_s1 + $0x128] sm:$0xff]  ;;  %725 = vmatpush3.bf16.msra.mxu0 %v724_v17  ;;  %v758_v34 = vpack.c.bf16 %v82_v30, %v81_v29  ;;  %v35_v37 = vld [vmem:[%s1294_s1 + $0x30] sm:$0xff]  ;;  %v730_v39 = vpack.c.bf16 %v52_v36, %v51_v35 }
   0xa   :  { %727 = vmatprep.subr.bf16.mxu0 %v726_v26  ;;  %v760_v38 = vpack.c.bf16 %v66_v32, %v65_v31  ;;  %v36_v40 = vld [vmem:[%s1294_s1 + $0x38] sm:$0xff]  ;;  %v83_v41 = vld [vmem:[%s1294_s1 + $0x1b0] sm:$0xff]  ;;  %v53_v46 = vld [vmem:[%s1294_s1 + $0xc0] sm:$0xff] }
   0xb   :  { %757 = vmatpush3.bf16.msra.mxu1 %v756_v25  ;;  %v84_v42 = vld [vmem:[%s1294_s1 + $0x1b8] sm:$0xff]  ;;  %v67_v44 = vld [vmem:[%s1294_s1 + $0x130] sm:$0xff]  ;;  %v54_v47 = vld [vmem:[%s1294_s1 + $0xc8] sm:$0xff]  ;;  %v732_v48 = vpack.c.bf16 %v36_v40, %v35_v37 }
   0xc   :  { %759 = vmatprep.subr.bf16.mxu1 %v758_v34  ;;  %v762_v43 = vpack.c.bf16 %v84_v42, %v83_v41  ;;  %v68_v45 = vld [vmem:[%s1294_s1 + $0x138] sm:$0xff]  ;;  %v85_v49 = vld [vmem:[%s1294_s1 + $0x1c0] sm:$0xff]  ;;  %v86_v50 = vld [vmem:[%s1294_s1 + $0x1c8] sm:$0xff]  ;;  %v734_v52 = vpack.c.bf16 %v54_v47, %v53_v46 }
   0xd   :  { %729 = vmatpush3.bf16.msra.mxu0 %v728_v33  ;;  %v764_v51 = vpack.c.bf16 %v68_v45, %v67_v44  ;;  %v37_v53 = vld [vmem:[%s1294_s1 + $0x40] sm:$0xff]  ;;  %v38_v54 = vld [vmem:[%s1294_s1 + $0x48] sm:$0xff]  ;;  %v766_v56 = vpack.c.bf16 %v86_v50, %v85_v49  ;;  %v55_v58 = vld [vmem:[%s1294_s1 + $0xd0] sm:$0xff] }
   0xe   :  { %731 = vmatprep.subr.bf16.mxu0 %v730_v39  ;;  %v69_v55 = vld [vmem:[%s1294_s1 + $0x140] sm:$0xff]  ;;  %v70_v57 = vld [vmem:[%s1294_s1 + $0x148] sm:$0xff]  ;;  %v56_v59 = vld [vmem:[%s1294_s1 + $0xd8] sm:$0xff]  ;;  %v736_v62 = vpack.c.bf16 %v38_v54, %v37_v53 }
   0xf   :  { %761 = vmatpush3.bf16.msra.mxu1 %v760_v38  ;;  %v87_v60 = vld [vmem:[%s1294_s1 + $0x1d0] sm:$0xff]  ;;  %v88_v61 = vld [vmem:[%s1294_s1 + $0x1d8] sm:$0xff]  ;;  %v768_v63 = vpack.c.bf16 %v70_v57, %v69_v55  ;;  %v738_v0 = vpack.c.bf16 %v56_v59, %v55_v58  ;;  %v57_v6 = vld [vmem:[%s1294_s1 + $0xe0] sm:$0xff] }
  0x10   :  { %763 = vmatprep.subr.bf16.mxu1 %v762_v43  ;;  %v39_v1 = vld [vmem:[%s1294_s1 + $0x50] sm:$0xff]  ;;  %v40_v2 = vld [vmem:[%s1294_s1 + $0x58] sm:$0xff]  ;;  %v770_v4 = vpack.c.bf16 %v88_v61, %v87_v60  ;;  %v58_v7 = vld [vmem:[%s1294_s1 + $0xe8] sm:$0xff] }
  0x11   :  { %733 = vmatpush3.bf16.msra.mxu0 %v732_v48  ;;  %v71_v3 = vld [vmem:[%s1294_s1 + $0x150] sm:$0xff]  ;;  %v72_v5 = vld [vmem:[%s1294_s1 + $0x158] sm:$0xff]  ;;  %v89_v8 = vld [vmem:[%s1294_s1 + $0x1e0] sm:$0xff]  ;;  %v740_v10 = vpack.c.bf16 %v40_v2, %v39_v1  ;;  %v742_v14 = vpack.c.bf16 %v58_v7, %v57_v6  ;;  %v859_v1 = vmov 0.0  }
  0x12   :  { %735 = vmatprep.subr.bf16.mxu0 %v734_v52  ;;  %v90_v9 = vld [vmem:[%s1294_s1 + $0x1e8] sm:$0xff]  ;;  %v41_v11 = vld [vmem:[%s1294_s1 + $0x60] sm:$0xff]  ;;  %v772_v13 = vpack.c.bf16 %v72_v5, %v71_v3  ;;  %v59_v19 = vld [vmem:[%s1294_s1 + $0xf0] sm:$0xff]  ;;  %v857_v52 = vmov 0.0|0.0  }
  0x13   :  { %765 = vmatpush3.bf16.msra.mxu1 %v764_v51  ;;  %v23_v12 = vld [vmem:[%s1295_s0 + $0x8] sm:$0xff]  ;;  %v73_v16 = vld [vmem:[%s1294_s1 + $0x160] sm:$0xff]  ;;  %v774_v18 = vpack.c.bf16 %v90_v9, %v89_v8  ;;  %v60_v20 = vld [vmem:[%s1294_s1 + $0xf8] sm:$0xff] }
  0x14   :  { %767 = vmatprep.subr.bf16.mxu1 %v766_v56  ;;  %v42_v15 = vld [vmem:[%s1294_s1 + $0x68] sm:$0xff]  ;;  %208 = vmatprep.mubr.f32.mxu0 %v23_v12  ;;  %v25_v21 = vld [vmem:[%s1295_s0 + $0x18] sm:$0xff]  ;;  %v91_v22 = vld [vmem:[%s1294_s1 + $0x1f0] sm:$0xff]  ;;  %v746_v26 = vpack.c.bf16 %v60_v20, %v59_v19 }
  0x15   :  { %737 = vmatpush3.bf16.msra.mxu0 %v736_v62  ;;  %v74_v17 = vld [vmem:[%s1294_s1 + $0x168] sm:$0xff]  ;;  %v92_v23 = vld [vmem:[%s1294_s1 + $0x1f8] sm:$0xff]  ;;  %278 = vmatprep.mubr.f32.mxu1 %v25_v21  ;;  %v744_v24 = vpack.c.bf16 %v42_v15, %v41_v11  ;;  %v43_v27 = vld [vmem:[%s1294_s1 + $0x70] sm:$0xff] }
  0x16   :  { %739 = vmatprep.subr.bf16.mxu0 %v738_v0  ;;  %v776_v25 = vpack.c.bf16 %v74_v17, %v73_v16  ;;  %v44_v28 = vld [vmem:[%s1294_s1 + $0x78] sm:$0xff]  ;;  %v75_v29 = vld [vmem:[%s1294_s1 + $0x170] sm:$0xff]  ;;  %v778_v30 = vpack.c.bf16 %v92_v23, %v91_v22  ;;  %v109_v32 = vld [vmem:[%s1294_s1 + $0x280] sm:$0xff] }
  0x17   :  { %769 = vmatpush3.bf16.msra.mxu1 %v768_v63  ;;  %v76_v31 = vld [vmem:[%s1294_s1 + $0x178] sm:$0xff]  ;;  %v110_v33 = vld [vmem:[%s1294_s1 + $0x288] sm:$0xff]  ;;  %v748_v34 = vpack.c.bf16 %v44_v28, %v43_v27  ;;  %v93_v37 = vld [vmem:[%s1294_s1 + $0x200] sm:$0xff] }
  0x18   :  { %771 = vmatprep.subr.bf16.mxu1 %v770_v4  ;;  %v780_v35 = vpack.c.bf16 %v76_v31, %v75_v29  ;;  %v782_v36 = vpack.c.bf16 %v110_v33, %v109_v32  ;;  %v94_v38 = vld [vmem:[%s1294_s1 + $0x208] sm:$0xff]  ;;  %v111_v39 = vld [vmem:[%s1294_s1 + $0x290] sm:$0xff]  ;;  %v112_v40 = vld [vmem:[%s1294_s1 + $0x298] sm:$0xff] }
  0x19   :  { %741 = vmatpush3.bf16.msra.mxu0 %v740_v10  ;;  %v125_v41 = vld [vmem:[%s1294_s1 + $0x300] sm:$0xff]  ;;  %v126_v42 = vld [vmem:[%s1294_s1 + $0x308] sm:$0xff]  ;;  %v784_v44 = vpack.c.bf16 %v94_v38, %v93_v37  ;;  %v24_v45 = vld [vmem:[%s1295_s0 + $0x10] sm:$0xff]  ;;  %v786_v46 = vpack.c.bf16 %v112_v40, %v111_v39 }
  0x1a   :  { %743 = vmatprep.subr.bf16.mxu0 %v742_v14  ;;  %v22_v43 = vld [vmem:[%s1295_s0] sm:$0xff]  ;;  %v95_v47 = vld [vmem:[%s1294_s1 + $0x210] sm:$0xff]  ;;  %v96_v48 = vld [vmem:[%s1294_s1 + $0x218] sm:$0xff]  ;;  %v815_v50 = vpack.c.bf16 %v126_v42, %v125_v41 }
  0x1b   :  { %773 = vmatpush3.bf16.msra.mxu1 %v772_v13  ;;  %v113_v49 = vld [vmem:[%s1294_s1 + $0x2a0] sm:$0xff]  ;;  %v114_v51 = vld [vmem:[%s1294_s1 + $0x2a8] sm:$0xff]  ;;  %v127_v53 = vld [vmem:[%s1294_s1 + $0x310] sm:$0xff]  ;;  %v788_v56 = vpack.c.bf16 %v96_v48, %v95_v47 }
  0x1c   :  { %775 = vmatprep.subr.bf16.mxu1 %v774_v18  ;;  %v128_v54 = vld [vmem:[%s1294_s1 + $0x318] sm:$0xff]  ;;  %v27_v55 = vld [vmem:[%s1295_s0 + $0x28] sm:$0xff]  ;;  %v790_v57 = vpack.c.bf16 %v114_v51, %v113_v49  ;;  %v97_v58 = vld [vmem:[%s1294_s1 + $0x220] sm:$0xff] }
  0x1d   :  { %745 = vmatpush3.bf16.msra.mxu0 %v744_v24  ;;  %v98_v59 = vld [vmem:[%s1294_s1 + $0x228] sm:$0xff]  ;;  %v115_v60 = vld [vmem:[%s1294_s1 + $0x2b0] sm:$0xff]  ;;  %v818_v61 = vpack.c.bf16 %v128_v54, %v127_v53  ;;  %v116_v62 = vld [vmem:[%s1294_s1 + $0x2b8] sm:$0xff] }
  0x1e   :  { %747 = vmatprep.subr.bf16.mxu0 %v746_v26  ;;  %v129_v63 = vld [vmem:[%s1294_s1 + $0x320] sm:$0xff]  ;;  %v130_v0 = vld [vmem:[%s1294_s1 + $0x328] sm:$0xff]  ;;  %v792_v2 = vpack.c.bf16 %v98_v59, %v97_v58  ;;  %v794_v3 = vpack.c.bf16 %v116_v62, %v115_v60  ;;  %v99_v4 = vld [vmem:[%s1294_s1 + $0x230] sm:$0xff]  ;;  %v10_v62 = vstv %s1297_s4 }
  0x1f   :  { %777 = vmatpush3.bf16.msra.mxu1 %v776_v25  ;;  %v100_v5 = vld [vmem:[%s1294_s1 + $0x238] sm:$0xff]  ;;  %v117_v6 = vld [vmem:[%s1294_s1 + $0x2c0] sm:$0xff]  ;;  %v821_v7 = vpack.c.bf16 %v130_v0, %v129_v63  ;;  %v118_v8 = vld [vmem:[%s1294_s1 + $0x2c8] sm:$0xff]  ;;  %11 = vst [vmem:[#allocation2] sm:$0x1] %v10_v62 }
  0x20   :  { %779 = vmatprep.subr.bf16.mxu1 %v778_v30  ;;  %v131_v9 = vld [vmem:[%s1294_s1 + $0x330] sm:$0xff]  ;;  %v132_v10 = vld [vmem:[%s1294_s1 + $0x338] sm:$0xff]  ;;  %v796_v11 = vpack.c.bf16 %v100_v5, %v99_v4  ;;  %v798_v12 = vpack.c.bf16 %v118_v8, %v117_v6  ;;  %v101_v13 = vld [vmem:[%s1294_s1 + $0x240] sm:$0xff] }
  0x21   :  { %749 = vmatpush3.bf16.msra.mxu0 %v748_v34  ;;  %v102_v14 = vld [vmem:[%s1294_s1 + $0x248] sm:$0xff]  ;;  %v824_v15 = vpack.c.bf16 %v132_v10, %v131_v9  ;;  %v119_v16 = vld [vmem:[%s1294_s1 + $0x2d0] sm:$0xff]  ;;  %v120_v17 = vld [vmem:[%s1294_s1 + $0x2d8] sm:$0xff] }
  0x22   :  { %783 = vmatprep.subr.bf16.mxu0 %v782_v36  ;;  %v800_v18 = vpack.c.bf16 %v102_v14, %v101_v13  ;;  %v802_v19 = vpack.c.bf16 %v120_v17, %v119_v16  ;;  %v103_v20 = vld [vmem:[%s1294_s1 + $0x250] sm:$0xff]  ;;  %v104_v21 = vld [vmem:[%s1294_s1 + $0x258] sm:$0xff]  ;;  %v121_v23 = vld [vmem:[%s1294_s1 + $0x2e0] sm:$0xff] }
  0x23   :  { %781 = vmatpush3.bf16.msra.mxu1 %v780_v35  ;;  %v28_v22 = vld [vmem:[%s1295_s0 + $0x30] sm:$0xff]  ;;  %v122_v24 = vld [vmem:[%s1294_s1 + $0x2e8] sm:$0xff]  ;;  %v804_v25 = vpack.c.bf16 %v104_v21, %v103_v20  ;;  %v105_v27 = vld [vmem:[%s1294_s1 + $0x260] sm:$0xff] }
  0x24   :  { %814 = vmatprep.subr.bf16.mxu1 %v857_v52  ;;  %209 = vmatmul.mubr.f32.vlgmr.msra.gmra.mrb[0].mxu0 %v22_v43  ;;  %v806_v26 = vpack.c.bf16 %v122_v24, %v121_v23  ;;  %v106_v28 = vld [vmem:[%s1294_s1 + $0x268] sm:$0xff]  ;;  %v123_v29 = vld [vmem:[%s1294_s1 + $0x2f0] sm:$0xff]  ;;  %v124_v30 = vld [vmem:[%s1294_s1 + $0x2f8] sm:$0xff] }
  0x25   :  { %785 = vmatpush3.bf16.msra.mxu0 %v784_v44  ;;  %348 = vmatprep.mubr.f32.mxu0 %v27_v55  ;;  %v808_v31 = vpack.c.bf16 %v106_v28, %v105_v27  ;;  %v810_v32 = vpack.c.bf16 %v124_v30, %v123_v29  ;;  %v107_v33 = vld [vmem:[%s1294_s1 + $0x270] sm:$0xff]  ;;  %v108_v34 = vld [vmem:[%s1294_s1 + $0x278] sm:$0xff]  ;;  %v26_v36 = vld [vmem:[%s1295_s0 + $0x20] sm:$0xff] }
  0x26   :  { %279 = vmatmul.mubr.f32.vlgmr.msra.gmra.mrb[0].mxu1 %v24_v45  ;;  %787 = vmatprep.subr.bf16.mxu0 %v786_v46  ;;  %v812_v35 = vpack.c.bf16 %v108_v34, %v107_v33  ;;  %v425_v37 = vld [vmem:[%s1296_s3] sm:$0xff]  ;;  %v426_v38 = vld [vmem:[%s1296_s3 + $0x8] sm:$0xff]  ;;  %v427_v39 = vld [vmem:[%s1296_s3 + $0x10] sm:$0xff] }
  0x27   :  { %816 = vmatpush3.bf16.msra.mxu1 %v815_v50  ;;  %680 = vmatprep.mubr.msk.f32.mxu1 %vm858_vm0, %v859_v1  ;;  %v827_v40 = vpack.c.bf16 %v426_v38, %v425_v37  ;;  %v428_v41 = vld [vmem:[%s1296_s3 + $0x18] sm:$0xff]  ;;  %v429_v43 = vld [vmem:[%s1296_s3 + $0x20] sm:$0xff]  ;;  %v430_v44 = vld [vmem:[%s1296_s3 + $0x28] sm:$0xff] }
  0x28   :  { %817 = vmatprep.subr.bf16.mxu1 %v857_v52  ;;  %v830_v42 = vpack.c.bf16 %v428_v41, %v427_v39  ;;  %v833_v45 = vpack.c.bf16 %v430_v44, %v429_v43  ;;  %v431_v46 = vld [vmem:[%s1296_s3 + $0x30] sm:$0xff]  ;;  %v432_v47 = vld [vmem:[%s1296_s3 + $0x38] sm:$0xff]  ;;  %v433_v49 = vld [vmem:[%s1296_s3 + $0x40] sm:$0xff] }
  0x29   :  { %789 = vmatpush3.bf16.msra.mxu0 %v788_v56  ;;  %v836_v48 = vpack.c.bf16 %v432_v47, %v431_v46  ;;  %v434_v50 = vld [vmem:[%s1296_s3 + $0x48] sm:$0xff]  ;;  %v435_v53 = vld [vmem:[%s1296_s3 + $0x50] sm:$0xff]  ;;  %v436_v54 = vld [vmem:[%s1296_s3 + $0x58] sm:$0xff] }
  0x2a   :  { %791 = vmatprep.subr.bf16.mxu0 %v790_v57  ;;  %v839_v51 = vpack.c.bf16 %v434_v50, %v433_v49  ;;  %v842_v55 = vpack.c.bf16 %v436_v54, %v435_v53  ;;  %v437_v56 = vld [vmem:[%s1296_s3 + $0x60] sm:$0xff]  ;;  %v438_v57 = vld [vmem:[%s1296_s3 + $0x68] sm:$0xff]  ;;  %v439_v59 = vld [vmem:[%s1296_s3 + $0x70] sm:$0xff] }
  0x2b   :  { %819 = vmatpush3.bf16.msra.mxu1 %v818_v61  ;;  %v845_v58 = vpack.c.bf16 %v438_v57, %v437_v56  ;;  %v440_v60 = vld [vmem:[%s1296_s3 + $0x78] sm:$0xff] }
  0x2c   :  { %820 = vmatprep.subr.bf16.mxu1 %v857_v52  ;;  %v848_v61 = vpack.c.bf16 %v440_v60, %v439_v59 }
  0x2d   :  { %793 = vmatpush3.bf16.msra.mxu0 %v792_v2 }
  0x2e   :  { %795 = vmatprep.subr.bf16.mxu0 %v794_v3 }
  0x2f   :  { %822 = vmatpush3.bf16.msra.mxu1 %v821_v7 }
  0x30   :  { %823 = vmatprep.subr.bf16.mxu1 %v857_v52 }
  0x31   :  { %797 = vmatpush3.bf16.msra.mxu0 %v796_v11 }
  0x32   :  { %799 = vmatprep.subr.bf16.mxu0 %v798_v12 }
  0x33   :  { %825 = vmatpush3.bf16.msra.mxu1 %v824_v15  ;;  %v532_v15 = vld [vmem:[#allocation2] ss:$0 sm:$0xff] }
  0x34   :  { %826 = vmatprep.subr.bf16.mxu1 %v857_v52 }
  0x35   :  { %801 = vmatpush3.bf16.msra.mxu0 %v800_v18 }
  0x36   :  { %681 = vmatmul.mubr.msk.f32.vlgmr.msra.gmra.mrb[2].mxu1 %vm140_vm1, %v28_v22  ;;  %803 = vmatprep.subr.bf16.mxu0 %v802_v19 }
  0x37   :  { %715 = vmatprep.mubr.msk.f32.mxu1 %vm858_vm0, %v859_v1  ;;  %828 = vmatpush3.bf16.msra.mxu1 %v827_v40 }
  0x38   :  { %829 = vmatprep.subr.bf16.mxu1 %v857_v52 }
  0x39   :  { %805 = vmatpush3.bf16.msra.mxu0 %v804_v25 }
  0x3a   :  { %807 = vmatprep.subr.bf16.mxu0 %v806_v26 }
  0x3b   :  { %831 = vmatpush3.bf16.msra.mxu1 %v830_v42 }
  0x3c   :  { %832 = vmatprep.subr.bf16.mxu1 %v857_v52 }
  0x3d   :  { %809 = vmatpush3.bf16.msra.mxu0 %v808_v31 }
  0x3e   :  { %811 = vmatprep.subr.bf16.mxu0 %v810_v32 }
  0x3f   :  { %834 = vmatpush3.bf16.msra.mxu1 %v833_v45 }
  0x40   :  { %835 = vmatprep.subr.bf16.mxu1 %v857_v52 }
  0x41   :  { %813 = vmatpush3.bf16.msra.mxu0 %v812_v35 }
  0x43   :  { %837 = vmatpush3.bf16.msra.mxu1 %v836_v48 }
  0x44   :  { %349 = vmatmul.mubr.f32.vlgmr.msra.gmra.mrb[2].mxu0 %v26_v36  ;;  %838 = vmatprep.subr.bf16.mxu1 %v857_v52 }
  0x47   :  { %840 = vmatpush3.bf16.msra.mxu1 %v839_v51 }
  0x48   :  { %841 = vmatprep.subr.bf16.mxu1 %v857_v52 }
  0x4b   :  { %843 = vmatpush3.bf16.msra.mxu1 %v842_v55 }
  0x4c   :  { %844 = vmatprep.subr.bf16.mxu1 %v857_v52 }
  0x4f   :  { %846 = vmatpush3.bf16.msra.mxu1 %v845_v58 }
  0x50   :  { %847 = vmatprep.subr.bf16.mxu1 %v857_v52  ;;  %v530_v52 = vld [vmem:[%s1298_s2] ss:$0 sm:$0xff] }
  0x53   :  { %849 = vmatpush3.bf16.msra.mxu1 %v848_v61 }
  0xf7   :  { %v565_v63 = vpop.f32.mrb[0].mxu0 }
  0xf8   :  { %v566_v0 = vpop.f32.mrb[1].mxu0 }
  0xf9   :  { %v600_v1 = vpop.f32.mrb[0].mxu1  ;;  %v567_v2 = vadd.f32 %v566_v0, %v565_v63 }
  0xfa   :  { %v601_v3 = vpop.f32.mrb[1].mxu1 }
  0xfb   :  { %v602_v4 = vadd.f32 %v601_v3, %v600_v1  ;;  %v211_v5 = vadd.f32 %v567_v2, %v530_v52 }
  0xfd   :  { %v281_v6 = vadd.f32 %v602_v4, %v211_v5 }
 0x109   :  { %v420_v7 = vpop.f32.mrb[2].mxu1 }
 0x10a   :  { %v682_v8 = vpop.f32.mrb[3].mxu1 }
 0x117   :  { %v635_v9 = vpop.f32.mrb[2].mxu0 }
 0x118   :  { %v636_v10 = vpop.f32.mrb[3].mxu0 }
 0x119   :  { %v637_v11 = vadd.f32 %v636_v10, %v635_v9 }
 0x11b   :  { %v351_v12 = vadd.f32 %v637_v11, %v281_v6 }
 0x11d   :  { %v421_v13 = vadd.f32 %v420_v7, %v351_v12 }
 0x11f   :  { %v424_v14 = vmax.f32 %v421_v13, 0.0 }
 0x121   :  { %716 = vmatmul.mubr.f32.vlgmr.msra.gmra.mrb[4].mxu1 %v424_v14 }
 0x1f4   :  { %v514_v16 = vpop.f32.mrb[4].mxu1 }
 0x1f5   :  { %v515_v17 = vadd.f32 %v532_v15, %v514_v16  ;;  %v717_v18 = vpop.f32.mrb[5].mxu1 }
 0x1f7   :  { %v518_v19 = vsub.f32 0.0, %v515_v17 }
 0x1f9   :  { %v519_v20 = vmul.f32 1.442695, %v518_v19 }
 0x1fb   :  { %853 = vpow2.f32 %v519_v20 }
 0x205   :  { %v854_v21 = vpop.eup %853 }
 0x206   :  { %v521_v22 = vadd.f32 1.0, %v854_v21 }
 0x208   :  { %855 = vrcp.f32 %v521_v22 }
 0x212   :  { %v856_v23 = vpop.eup %855 }
 0x213   :  { %525 = vst.msk [vmem:[%s1299_s5] sm:$0xff] %vm524_vm2, %v856_v23 }

</bundles_post_ra>
